<compile_context>
chip_gen: v7x
topology: tpu7x:2x2x1
jax: 0.10.0
libtpu: 0.0.40
codegen_flags: <defaults>
</compile_context>

<pallas_src>
import jax
import jax.numpy as jnp
from jax import lax
from jax.experimental import pallas as pl
from jax.experimental.pallas import tpu as pltpu


_VMEM_LIMIT = 48 * 1024 * 1024  # explicit scoped-VMEM limit; fits v7x's 64 MiB


def _pick_tile(dim, pref, align):
    """Largest multiple of `align` <= `pref` that divides `dim`; else full dim.

    Guarantees the tile is either a multiple of `align` (8 for sublane dims,
    128 for lane dims) or exactly the array dim (always a legal block).  Never
    returns a sub-`align` partial tile, which would violate the (8,128)
    BlockSpec rule or degrade stores to masked partial writes.
    """
    if dim % align != 0:
        return dim                      # full-dim block is always legal
    t = min(pref, dim)
    t -= t % align
    while t >= align:
        if dim % t == 0:
            return t
        t -= align
    return dim


# ----------------------------------------------------------------------------
# Tiled, pipelined linear:  y = x @ w_t + b   (w_t pre-transposed to (K, N))
# ----------------------------------------------------------------------------
def _linear_kernel(x_ref, wt_ref, b_ref, o_ref, acc_ref):
    @pl.when(pl.program_id(2) == 0)
    def _():
        acc_ref[...] = jnp.zeros_like(acc_ref)

    # Operands stay in their input dtype (f32 or bf16); accumulate in f32.
    acc_ref[...] += jnp.dot(x_ref[...], wt_ref[...],
                            preferred_element_type=jnp.float32)

    @pl.when(pl.program_id(2) == pl.num_programs(2) - 1)
    def _():
        o_ref[...] = (acc_ref[...] +
                      b_ref[...].astype(jnp.float32)).astype(o_ref.dtype)


def linear_pallas(x, w_t, b, *, out_dtype=None, tm=512, tn=512, tk=512):
    """x: (M, K), w_t: (K, N), b: (N,) -> (M, N).

    Preferred 512^3 tiles amortize per-step overhead and stay far below the
    VMEM limit even double-buffered (~7 MiB f32, ~4 MiB bf16).
    """
    M, K = x.shape
    N = w_t.shape[1]
    out_dtype = x.dtype if out_dtype is None else out_dtype
    TM = _pick_tile(M, tm, 8)
    TN = _pick_tile(N, tn, 128)
    TK = _pick_tile(K, tk, 128)
    grid = (M // TM, N // TN, K // TK)
    cost = pl.CostEstimate(
        flops=2 * M * N * K,
        transcendentals=0,
        bytes_accessed=int((M * K + K * N) * x.dtype.itemsize
                           + M * N * jnp.dtype(out_dtype).itemsize
                           + N * b.dtype.itemsize))
    return pl.pallas_call(
        _linear_kernel,
        out_shape=jax.ShapeDtypeStruct((M, N), out_dtype),
        grid=grid,
        in_specs=[
            pl.BlockSpec((TM, TK), lambda i, j, k: (i, k)),
            pl.BlockSpec((TK, TN), lambda i, j, k: (k, j)),
            pl.BlockSpec((1, TN), lambda i, j, k: (0, j)),
        ],
        out_specs=pl.BlockSpec((TM, TN), lambda i, j, k: (i, j)),
        scratch_shapes=[pltpu.VMEM((TM, TN), jnp.float32)],
        compiler_params=pltpu.CompilerParams(
            dimension_semantics=("parallel", "parallel", "arbitrary"),
            vmem_limit_bytes=_VMEM_LIMIT),
        cost_estimate=cost,
    )(x, w_t, b.reshape(1, N))


# ----------------------------------------------------------------------------
# Flash attention: grid = (B*H, L//TQ, S//TK), online softmax over the kv axis.
# ----------------------------------------------------------------------------
def _flash_kernel(q_ref, k_ref, v_ref, o_ref, m_sc, l_sc, acc_sc):
    ki = pl.program_id(2)

    @pl.when(ki == 0)
    def _():
        m_sc[...] = jnp.full_like(m_sc, -jnp.inf)
        l_sc[...] = jnp.zeros_like(l_sc)
        acc_sc[...] = jnp.zeros_like(acc_sc)

    q = q_ref[0]                        # (TQ, dh)  1/sqrt(dh) folded into W_q
    k = k_ref[0]                        # (TK, dh)
    v = v_ref[0]                        # (TK, dv)

    # q @ k^T without transposing k: contract the last dims (no XLU transpose).
    s = lax.dot_general(q, k, (((1,), (1,)), ((), ())),
                        preferred_element_type=jnp.float32)      # (TQ, TK) f32

    m_prev = m_sc[...]
    m_new = jnp.maximum(m_prev, jnp.max(s, axis=-1, keepdims=True))
    alpha = jnp.exp(m_prev - m_new)                              # (TQ, 1) f32
    p = jnp.exp(s - m_new)                                       # (TQ, TK) f32, UNnormalized
    l_sc[...] = alpha * l_sc[...] + jnp.sum(p, axis=-1, keepdims=True)
    # Normalization is NOT applied to p (TQ*TK multiplies); it is folded onto
    # the (TQ, dv) accumulator in the epilogue instead.
    acc_sc[...] = alpha * acc_sc[...] + jnp.dot(
        p.astype(v.dtype), v, preferred_element_type=jnp.float32)
    m_sc[...] = m_new

    @pl.when(ki == pl.num_programs(2) - 1)
    def _():
        # Exact divide for parity with the PyTorch softmax; the epilogue runs
        # once per q-tile so it is off the critical slot either way
        # (pl.reciprocal(..., approx=True) is a free EUP alternative).
        o_ref[0] = (acc_sc[...] / l_sc[...]).astype(o_ref.dtype)


def flash_attention_pallas(q, k, v, *, tq=256, tk=256):
    """q, k: (B*H, Lq, dh), v: (B*H, S, dv) -> (B*H, Lq, dv), head-major."""
    BH, Lq, dh = q.shape
    S, dv = v.shape[1], v.shape[2]
    assert k.shape == (BH, S, dh)
    TQ = _pick_tile(Lq, tq, 8)
    # TODO(synk): for S with no multiple-of-8 divisor, add an in-kernel key
    # mask so S can be zero-padded instead of falling back to full-S blocks.
    TK = _pick_tile(S, tk, 8)
    grid = (BH, Lq // TQ, S // TK)
    cost = pl.CostEstimate(
        flops=2 * BH * Lq * S * (dh + dv),
        transcendentals=BH * Lq * S,
        bytes_accessed=int((q.size + BH * Lq * dv
                            + (k.size + v.size) * (Lq // TQ)) * q.dtype.itemsize))
    return pl.pallas_call(
        _flash_kernel,
        out_shape=jax.ShapeDtypeStruct((BH, Lq, dv), q.dtype),
        grid=grid,
        in_specs=[
            # q block ignores ki -> stays resident across the whole kv loop.
            pl.BlockSpec((1, TQ, dh), lambda b, qi, ki: (b, qi, 0)),
            # If K/V DMA is still exposed at large S (wall >> compute), add
            # pipeline_mode=pl.Buffered(3) here.
            pl.BlockSpec((1, TK, dh), lambda b, qi, ki: (b, ki, 0)),
            pl.BlockSpec((1, TK, dv), lambda b, qi, ki: (b, ki, 0)),
        ],
        out_specs=pl.BlockSpec((1, TQ, dv), lambda b, qi, ki: (b, qi, 0)),
        scratch_shapes=[
            pltpu.VMEM((TQ, 1), jnp.float32),    # running max m
            pltpu.VMEM((TQ, 1), jnp.float32),    # running sum l
            pltpu.VMEM((TQ, dv), jnp.float32),   # output accumulator
        ],
        compiler_params=pltpu.CompilerParams(
            dimension_semantics=("parallel", "parallel", "arbitrary"),
            vmem_limit_bytes=_VMEM_LIMIT),
        cost_estimate=cost,
    )(q, k, v)


# ----------------------------------------------------------------------------
# Parameter prep (done ONCE): pack q/k weights, fold scaling, pre-transpose.
# ----------------------------------------------------------------------------
def prepare_params(params, num_heads):
    E = params["q_w"].shape[0]
    scaling = float(E // num_heads) ** (-0.5)
    return {
        "w_qk_t": jnp.concatenate([params["q_w"] * scaling, params["k_w"]], axis=0).T,
        "b_qk": jnp.concatenate([params["q_b"] * scaling, params["k_b"]], axis=0),
        "w_v_t": params["v_w"].T,
        "b_v": params["v_b"],
        "w_out_t": params["out_w"].T,
        "b_out": params["out_b"],
    }


def multihead_attention_forward(query, key, value, prep, num_heads, pos=None,
                                compute_dtype=None):
    """Default forward path of the module.  Returns (L, B, E).

    `key` is ignored: the module overwrites it with with_pos_embed(query, pos).
    compute_dtype: MXU operand dtype (jnp.bfloat16 recommended on v6e/v7x);
    accumulation and softmax statistics stay in f32 regardless.
    """
    del key
    x = query if pos is None else query + pos
    L, B, E = x.shape
    S = value.shape[0]
    assert S == L, "module requires key/value seq len == query seq len"
    H = num_heads
    dh = E // H
    assert dh * H == E, "embed_dim must be divisible by num_heads"
    out_dtype = query.dtype
    cdt = jnp.dtype(out_dtype if compute_dtype is None else compute_dtype)

    w_qk = prep["w_qk_t"].astype(cdt)
    w_v = prep["w_v_t"].astype(cdt)
    w_o = prep["w_out_t"].astype(cdt)

    # seq-major -> batch-major: one relayout pass per tensor, forced by the
    # (L, B, E) module interface.
    # TODO(synk): accept batch-major / head-major inputs (and fuse the final
    # transpose into the out-projection out_spec) to drop these extra passes.
    xt = x.transpose(1, 0, 2).reshape(B * L, E).astype(cdt)
    vt = value.transpose(1, 0, 2).reshape(B * S, E).astype(cdt)

    qk = linear_pallas(xt, w_qk, prep["b_qk"], out_dtype=cdt)   # (B*L, 2E) = [q|k]
    vp = linear_pallas(vt, w_v, prep["b_v"], out_dtype=cdt)     # (B*S, E)

    # Head-major (B*H, seq, dh) layout for the flash kernel: the block last dim
    # equals head_dim (full-dim exception of the (8,128) rule), so there are no
    # misaligned lane slices or in-kernel head concatenates.
    def to_heads(t, seq):
        return (t.reshape(B, seq, H, dh).transpose(0, 2, 1, 3)
                 .reshape(B * H, seq, dh))

    q_h = to_heads(qk[:, :E], L)       # already pre-scaled by 1/sqrt(dh)
    k_h = to_heads(qk[:, E:], L)
    v_h = to_heads(vp, S)

    # Pad queries up to a multiple of the q-tile (padded rows are zeros ->
    # finite throwaway outputs; no masking needed, sliced off below).
    tq = min(256, -(-L // 8) * 8)
    Lp = -(-L // tq) * tq
    if Lp != L:
        q_h = jnp.pad(q_h, ((0, 0), (0, Lp - L), (0, 0)))

    o_h = flash_attention_pallas(q_h, k_h, v_h, tq=tq)          # (B*H, Lp, dh)
    o_h = o_h[:, :L]

    attn = o_h.reshape(B, H, L, dh).transpose(0, 2, 1, 3).reshape(B * L, E)
    out = linear_pallas(attn, w_o, prep["b_out"], out_dtype=out_dtype)
    return out.reshape(B, L, E).transpose(1, 0, 2)              # (L, B, E)

    # TODO(synk): key_padding_mask / attn_mask / residual_attn / need_weights /
    # add_zero_attn / dropout paths are not exercised by the default forward
    # and are omitted.


# ----------------------------------------------------------------------------
# Pure-JAX reference (mirrors the torch code, incl. the key = query override).
# ----------------------------------------------------------------------------
def _reference_forward(query, key, value, params, num_heads, pos=None):
    del key
    x = query if pos is None else query + pos
    L, B, E = x.shape
    S = value.shape[0]
    head_dim = E // num_heads
    scaling = float(head_dim) ** (-0.5)
    q = (x.reshape(L * B, E) @ params["q_w"].T + params["q_b"]) * scaling
    k = x.reshape(L * B, E) @ params["k_w"].T + params["k_b"]
    v = value.reshape(S * B, -1) @ params["v_w"].T + params["v_b"]
    q = q.reshape(L, B * num_heads, head_dim).transpose(1, 0, 2)
    k = k.reshape(L, B * num_heads, head_dim).transpose(1, 0, 2)
    v = v.reshape(S, B * num_heads, head_dim).transpose(1, 0, 2)
    s = jnp.einsum("bld,bsd->bls", q, k)
    p = jax.nn.softmax(s, axis=-1)
    a = jnp.einsum("bls,bsd->bld", p, v)
    a = a.transpose(1, 0, 2).reshape(L * B, E)
    out = a @ params["out_w"].T + params["out_b"]
    return out.reshape(L, B, E)


def init_params(key, embed_dim, kdim=None, vdim=None):
    kdim = embed_dim if kdim is None else kdim
    vdim = embed_dim if vdim is None else vdim
    keys = jax.random.split(key, 8)
    scale = 0.1
    return {
        "q_w": scale * jax.random.normal(keys[0], (embed_dim, embed_dim), jnp.float32),
        "q_b": scale * jax.random.normal(keys[1], (embed_dim,), jnp.float32),
        "k_w": scale * jax.random.normal(keys[2], (embed_dim, kdim), jnp.float32),
        "k_b": scale * jax.random.normal(keys[3], (embed_dim,), jnp.float32),
        "v_w": scale * jax.random.normal(keys[4], (embed_dim, vdim), jnp.float32),
        "v_b": scale * jax.random.normal(keys[5], (embed_dim,), jnp.float32),
        "out_w": scale * jax.random.normal(keys[6], (embed_dim, embed_dim), jnp.float32),
        "out_b": scale * jax.random.normal(keys[7], (embed_dim,), jnp.float32),
    }


if __name__ == "__main__":
    # Small shapes: tgt_len=src_len=8, batch=2, embed_dim=32, num_heads=4.
    L, S, B, E, H = 8, 8, 2, 32, 4
    root = jax.random.PRNGKey(0)
    kq, kk, kv, kp = jax.random.split(root, 4)
    query = jax.random.normal(kq, (L, B, E), jnp.float32)
    key = jax.random.normal(kk, (S, B, E), jnp.float32)      # ignored by the module
    value = jax.random.normal(kv, (S, B, E), jnp.float32)
    params = init_params(kp, E)
    prep = prepare_params(params, H)

    ref = _reference_forward(query, key, value, params, H)

    # f32 path: strict parity with the reference.
    out = multihead_attention_forward(query, key, value, prep, H)
    out = jax.block_until_ready(out)
    assert out.shape == (L, B, E)
    assert jnp.allclose(out, ref, rtol=2e-3, atol=2e-3), "f32 mismatch vs reference"

    # bf16 MXU-operand path (f32 accumulation) — the fast path on v6e/v7x.
    out_bf16 = multihead_attention_forward(query, key, value, prep, H,
                                           compute_dtype=jnp.bfloat16)
    out_bf16 = jax.block_until_ready(out_bf16)
    assert jnp.allclose(out_bf16.astype(jnp.float32), ref,
                        rtol=6e-2, atol=6e-2), "bf16 mismatch vs reference"

    print("KERNEL_OK")
</pallas_src>

<mosaic_0001>
module attributes {stable_mosaic.version = 11 : i64} {
  func.func @_linear_kernel(%arg0: i32, %arg1: i32, %arg2: i32, %arg3: memref<16x32xf32, #tpu.memory_space<vmem>>, %arg4: memref<32x64xf32, #tpu.memory_space<vmem>>, %arg5: memref<1x64xf32, #tpu.memory_space<vmem>>, %arg6: memref<16x64xf32, #tpu.memory_space<vmem>>, %arg7: memref<16x64xf32, #tpu.memory_space<vmem>>) attributes {dimension_semantics = [#tpu.dimension_semantics<parallel>, #tpu.dimension_semantics<parallel>, #tpu.dimension_semantics<arbitrary>], iteration_bounds = array<i64: 1, 1, 1>, scalar_prefetch = 0 : i64, scratch_operands = 1 : i64, tpu.core_type = #tpu.core_type<tc>, window_params = [{transform_indices = @transform_0, window_bounds = array<i64: 16, 32>}, {transform_indices = @transform_1, window_bounds = array<i64: 32, 64>}, {transform_indices = @transform_2, window_bounds = array<i64: 1, 64>}, {transform_indices = @transform_3, window_bounds = array<i64: 16, 64>}]} {
    %c0_i32 = arith.constant 0 : i32
    %0 = arith.cmpi eq, %arg2, %c0_i32 : i32
    %1 = arith.extui %0 : i1 to i32
    %c0_i32_0 = arith.constant 0 : i32
    %2 = arith.cmpi ne, %1, %c0_i32_0 : i32
    scf.if %2 {
      %cst_10 = arith.constant 0.000000e+00 : f32
      %12 = vector.broadcast %cst_10 : f32 to vector<16x64xf32>
      %c0_11 = arith.constant 0 : index
      %c0_12 = arith.constant 0 : index
      %13 = vector.load %arg7[%c0_11, %c0_12] : memref<16x64xf32, #tpu.memory_space<vmem>>, vector<16x64xf32>
      tpu.vector_store %arg7[%c0_11, %c0_12], %12 {strides = array<i32>} : memref<16x64xf32, #tpu.memory_space<vmem>>, vector<16x64xf32>,
    } else {
    }
    %c0 = arith.constant 0 : index
    %c0_1 = arith.constant 0 : index
    %3 = vector.load %arg7[%c0, %c0_1] : memref<16x64xf32, #tpu.memory_space<vmem>>, vector<16x64xf32>
    %c0_2 = arith.constant 0 : index
    %c0_3 = arith.constant 0 : index
    %4 = vector.load %arg3[%c0_2, %c0_3] : memref<16x32xf32, #tpu.memory_space<vmem>>, vector<16x32xf32>
    %c0_4 = arith.constant 0 : index
    %c0_5 = arith.constant 0 : index
    %5 = vector.load %arg4[%c0_4, %c0_5] : memref<32x64xf32, #tpu.memory_space<vmem>>, vector<32x64xf32>
    %cst = arith.constant dense<0.000000e+00> : vector<16x64xf32>
    %6 = tpu.matmul %4, %5, %cst {dimension_numbers = #tpu.dot_dimension_numbers<[1], [0], [0], [1], [0, 0, 1, 1], [], []>} : vector<16x32xf32>, vector<32x64xf32>, vector<16x64xf32> -> vector<16x64xf32>
    %7 = arith.addf %3, %6 : vector<16x64xf32>
    %c0_6 = arith.constant 0 : index
    %c0_7 = arith.constant 0 : index
    %8 = vector.load %arg7[%c0_6, %c0_7] : memref<16x64xf32, #tpu.memory_space<vmem>>, vector<16x64xf32>
    tpu.vector_store %arg7[%c0_6, %c0_7], %7 {strides = array<i32>} : memref<16x64xf32, #tpu.memory_space<vmem>>, vector<16x64xf32>,
    %c0_i32_8 = arith.constant 0 : i32
    %9 = arith.cmpi eq, %arg2, %c0_i32_8 : i32
    %10 = arith.extui %9 : i1 to i32
    %c0_i32_9 = arith.constant 0 : i32
    %11 = arith.cmpi ne, %10, %c0_i32_9 : i32
    scf.if %11 {
      %c0_10 = arith.constant 0 : index
      %c0_11 = arith.constant 0 : index
      %12 = vector.load %arg7[%c0_10, %c0_11] : memref<16x64xf32, #tpu.memory_space<vmem>>, vector<16x64xf32>
      %c0_12 = arith.constant 0 : index
      %c0_13 = arith.constant 0 : index
      %13 = vector.load %arg5[%c0_12, %c0_13] : memref<1x64xf32, #tpu.memory_space<vmem>>, vector<1x64xf32>
      %14 = vector.broadcast %13 : vector<1x64xf32> to vector<16x64xf32>
      %15 = arith.addf %12, %14 : vector<16x64xf32>
      %c0_14 = arith.constant 0 : index
      %c0_15 = arith.constant 0 : index
      %16 = vector.load %arg6[%c0_14, %c0_15] : memref<16x64xf32, #tpu.memory_space<vmem>>, vector<16x64xf32>
      tpu.vector_store %arg6[%c0_14, %c0_15], %15 {strides = array<i32>} : memref<16x64xf32, #tpu.memory_space<vmem>>, vector<16x64xf32>,
    } else {
    }
    return
  }
  func.func @transform_0(%arg0: i32, %arg1: i32, %arg2: i32) -> (i32, i32) {
    %c0_i32 = arith.constant 0 : i32
    return %arg0, %arg2 : i32, i32
  }
  func.func @transform_1(%arg0: i32, %arg1: i32, %arg2: i32) -> (i32, i32) {
    %c0_i32 = arith.constant 0 : i32
    return %arg2, %arg1 : i32, i32
  }
  func.func @transform_2(%arg0: i32, %arg1: i32, %arg2: i32) -> (i32, i32) {
    %c0_i32 = arith.constant 0 : i32
    %c0_i32_0 = arith.constant 0 : i32
    return %c0_i32, %arg1 : i32, i32
  }
  func.func @transform_3(%arg0: i32, %arg1: i32, %arg2: i32) -> (i32, i32) {
    %c0_i32 = arith.constant 0 : i32
    return %arg0, %arg1 : i32, i32
  }
}

</mosaic_0001>

<bundles_post_ra>
// kernel: tpu_custom_call.1
= control target key start
LH: loop header
LB: loop body
LE: loop exit
PB: predicated region body
PF: predicated region fallthrough
CT: control target
= control target key end

     0   :  { %8 = vsyncpa [#allocation4], 0  ;;  %s365_s0 = inlined_call_operand.hbm [shape: f32[16,32], index: 0, kind: input, shape index: {}]   ;;  %s366_s1 = inlined_call_operand.hbm [shape: f32[32,64], index: 1, kind: input, shape index: {}]   ;;  %s367_s2 = inlined_call_operand.vmem [shape: f32[1,64], index: 2, kind: input, shape index: {}]   ;;  %s368_s3 = inlined_call_operand.hbm [shape: f32[16,64], index: 3, kind: output, shape index: {}]  }
   0x1   :  { %9 = vsyncpa [#allocation7], 0 }
   0x2   :  { %10 = vsyncpa [#allocation5], 0  ;;  %s285_s12 = smov [#allocation3]   ;;  %s213_s16 = scalar_lea.hbm %s365_s0, 256 }
   0x3   :  { %s16_s13 = sshll.u32 %s285_s12, 4  ;;  %p214_p0 = scmp.ne.s32.totalorder %s365_s0, %s213_s16  ;;  %s17_s13 = int_to_ptr.vmem [resolvable:$true] %s16_s13 }
   0x4   :  { %p217_p1 = scmp.lt.u32.totalorder %s213_s16, %s365_s0 }
   0x6   :  { %p219_p2 = pnand %p217_p1, %p214_p0 }
   0x8   :  { %222 = shalt.err (!%p219_p2)
}
   0x9   :  { %s223_s21 = scalar_lea.vmem %s17_s13, 256  ;;  %p228_p4 = scmp.lt.s32.totalorder %s17_s13, %s17_s13 }
   0xa   :  { %p224_p3 = scmp.ne.s32.totalorder %s17_s13, %s223_s21  ;;  %p229_p5 = scmp.lt.s32.totalorder %s223_s21, %s223_s21 }
   0xc   :  { %p230_p6 = por %p229_p5, %p228_p4 }
   0xe   :  { %p231_p7 = pnand %p230_p6, %p224_p3 }
  0x10   :  { %234 = shalt.err (!%p231_p7)
}
  0x11   :  { %s286_s22 = smov 128   ;;  %s287_s23 = smov 8  }
  0x12   :  { %22 = dma.hbm_to_vmem [thread:$0]  %s365_s0, 256, %s17_s13, [#allocation4], %s286_s22, %s286_s22, %s287_s23  }
  0x13   :  { %s288_s26 = smov [#allocation6]   ;;  %s235_s30 = scalar_lea.hbm %s366_s1, 512 }
  0x14   :  { %s28_s27 = sshll.u32 %s288_s26, 4  ;;  %p236_p8 = scmp.ne.s32.totalorder %s366_s1, %s235_s30  ;;  %s29_s27 = int_to_ptr.vmem [resolvable:$true] %s28_s27 }
  0x15   :  { %p239_p9 = scmp.lt.u32.totalorder %s235_s30, %s366_s1 }
  0x17   :  { %p241_p10 = pnand %p239_p9, %p236_p8 }
  0x19   :  { %244 = shalt.err (!%p241_p10)
}
  0x1a   :  { %s245_s8 = scalar_lea.vmem %s29_s27, 512  ;;  %p250_p12 = scmp.lt.s32.totalorder %s29_s27, %s29_s27 }
  0x1b   :  { %p246_p11 = scmp.ne.s32.totalorder %s29_s27, %s245_s8  ;;  %p251_p13 = scmp.lt.s32.totalorder %s245_s8, %s245_s8 }
  0x1d   :  { %p252_p0 = por %p251_p13, %p250_p12 }
  0x1f   :  { %p253_p1 = pnand %p252_p0, %p246_p11 }
  0x21   :  { %256 = shalt.err (!%p253_p1)
}
  0x22   :  { %34 = dma.hbm_to_vmem [thread:$0]  %s366_s1, 512, %s29_s27, [#allocation7], %s286_s22, %s286_s22, %s287_s23  }
  0x23   :  { %279 = dma.done.wait [#allocation4], 256  }
  0x24   :  { %280 = vsyncadd [#allocation4], 4294967040 }
  0x25   :  { %281 = dma.done.wait [#allocation7], 512  }
  0x26   :  { %282 = vsyncadd [#allocation7], 4294966784  ;;  %vm47_vm0 = vcmask 523264   ;;  %v289_v0 = vmov 0.0   ;;  %vm58_vm1 = vcmask 261120   ;;  %v54_v1 = vld [vmem:[#allocation6] sm:$0xff] }
  0x27   :  { %49 = vst.msk [vmem:[#allocation2 + $0x8] sm:$0xff] %vm47_vm0, %v289_v0  ;;  %48 = vst.msk [vmem:[#allocation2] sm:$0xff] %vm47_vm0, %v289_v0  ;;  %v55_v2 = vld [vmem:[#allocation6 + $0x8] sm:$0xff]  ;;  %v56_v3 = vld [vmem:[#allocation6 + $0x10] sm:$0xff]  ;;  %s290_s11 = smov [#allocation8]  }
  0x28   :  { %v199_v4 = vpack.c.bf16 %v55_v2, %v54_v1  ;;  %v57_v5 = vld [vmem:[#allocation6 + $0x18] sm:$0xff]  ;;  %v52_v6 = vld [vmem:[#allocation3] sm:$0xff]  ;;  %v181_v15 = vld [vmem:[%s367_s2] ss:$0 sm:$0xff]  ;;  %s166_s12 = sshll.u32 %s290_s11, 4  ;;  %s167_s12 = int_to_ptr.vmem [resolvable:$true] %s166_s12 }
  0x29   :  { %v203_v7 = vpack.c.bf16 %v57_v5, %v56_v3  ;;  %196 = vmatprep.mubr.msk.f32.mxu0 %vm58_vm1, %v52_v6  ;;  %v53_v8 = vld [vmem:[#allocation3 + $0x8] sm:$0xff]  ;;  %s257_s13 = scalar_lea.vmem %s167_s12, 256  ;;  %p262_p3 = scmp.lt.s32.totalorder %s167_s12, %s167_s12 }
  0x2a   :  { %200 = vmatprep.subr.bf16.mxu0 %v199_v4  ;;  %p258_p2 = scmp.ne.s32.totalorder %s167_s12, %s257_s13  ;;  %p263_p4 = scmp.lt.s32.totalorder %s257_s13, %s257_s13 }
  0x2b   :  { %202 = vmatpush3.bf16.msra.mxu0 %v199_v4 }
  0x2c   :  { %204 = vmatprep.subr.bf16.mxu0 %v203_v7  ;;  %p264_p5 = por %p263_p4, %p262_p3 }
  0x2e   :  { %v51_v9 = vld [vmem:[#allocation2 + $0x8] sm:$0xff]  ;;  %v50_v10 = vld [vmem:[#allocation2] sm:$0xff]  ;;  %p265_p6 = pnand %p264_p5, %p258_p2 }
  0x2f   :  { %206 = vmatpush3.bf16.msra.mxu0 %v203_v7 }
  0x32   :  { %197 = vmatmul.mubr.msk.f32.vlgmr.msra.gmra.mrb[0].mxu0 %vm58_vm1, %v53_v8 }
 0x105   :  { %v198_v11 = vpop.f32.mrb[0].mxu0 }
 0x106   :  { %v141_v12 = vadd.f32 %v198_v11, %v51_v9  ;;  %v131_v13 = vpop.f32.mrb[1].mxu0 }
 0x107   :  { %v140_v14 = vadd.f32 %v131_v13, %v50_v10 }
 0x108   :  { %144 = vst.msk [vmem:[#allocation2 + $0x8] sm:$0xff] %vm47_vm0, %v141_v12 }
 0x109   :  { %143 = vst.msk [vmem:[#allocation2] sm:$0xff] %vm47_vm0, %v140_v14 }
 0x10f   :  { %v149_v16 = vld [vmem:[#allocation2 + $0x8] sm:$0xff] }
 0x110   :  { %v148_v17 = vld [vmem:[#allocation2] sm:$0xff]  ;;  %v158_v18 = vadd.f32 %v181_v15, %v149_v16 }
 0x111   :  { %v157_v19 = vadd.f32 %v181_v15, %v148_v17 }
 0x112   :  { %160 = vst.msk [vmem:[#allocation8 + $0x8] sm:$0xff] %vm47_vm0, %v158_v18 }
 0x113   :  { %159 = vst.msk [vmem:[#allocation8] sm:$0xff] %vm47_vm0, %v157_v19 }
 0x114   :  { %268 = shalt.err (!%p265_p6)
}
 0x115   :  { %s269_s15 = scalar_lea.hbm %s368_s3, 256 }
 0x116   :  { %p270_p7 = scmp.ne.s32.totalorder %s368_s3, %s269_s15  ;;  %p273_p8 = scmp.lt.u32.totalorder %s269_s15, %s368_s3 }
 0x118   :  { %p275_p9 = pnand %p273_p8, %p270_p7 }
 0x11a   :  { %278 = shalt.err (!%p275_p9)
}
 0x11b   :  { %172 = dma.vmem_to_hbm [thread:$0]  %s167_s12, 256, %s368_s3, [#allocation5], %s286_s22, %s286_s22, %s287_s23  }
 0x11c   :  { %283 = dma.done.wait [#allocation5], 256  }
 0x11d   :  { %284 = vsyncadd [#allocation5], 4294967040 }
 0x11e   :  { %176 = vsyncpa [#allocation4], 1 }
 0x11f   :  { %177 = vsyncpa [#allocation7], 1 }
 0x120   :  { %178 = vsyncpa [#allocation5], 1 }

</bundles_post_ra>
